<compile_context>
chip_gen: v5e
topology: v5e:2x2
jax: 0.10.0
libtpu: 0.0.40
codegen_flags: <defaults>
</compile_context>

<pallas_src>
import functools
from typing import NamedTuple

import jax
import jax.numpy as jnp
from jax.experimental import pallas as pl
from jax.experimental.pallas import tpu as pltpu

_LANE = 128          # vreg lane width (last dim)
_SUBLANE_BF16 = 16   # bf16 sublane packing (second-to-last dim)


def _round_up(n, m):
    return ((n + m - 1) // m) * m


def _pad2(a, rows, cols):
    return jnp.pad(a, ((0, rows - a.shape[0]), (0, cols - a.shape[1])))


def _nbytes(a):
    return a.size * a.dtype.itemsize


@functools.lru_cache(maxsize=1)
def _physical_vmem_bytes():
    """Generation-aware VMEM capacity (falls back to the smallest, v7x)."""
    try:
        info = pltpu.get_tpu_info()
        cap = int(getattr(info, "vmem_capacity_bytes", 0) or 0)
        if cap > 0:
            return cap
    except Exception:
        pass
    return 64 << 20  # conservative default: v7x per-TensorCore VMEM


class MLPParams(NamedTuple):
    """Lane-padded, dtype-converted parameters (prepared ONCE at init time)."""
    w1: jax.Array   # [d_in_p, h_p]  bf16
    b1: jax.Array   # [1, h_p]       f32
    w2: jax.Array   # [h_p, h_p]     bf16
    b2: jax.Array   # [1, h_p]       f32
    w3: jax.Array   # [h_p, a_p]     bf16
    b3: jax.Array   # [1, a_p]       f32
    d_in: int
    hidden: int
    action_dim: int


def prepare_params(w1, b1, w2, b2, w3, b3, *, weight_dtype=jnp.bfloat16):
    """Pad feature dims to the 128-lane width and cast weights for the MXU.

    Zero padding keeps results identical; done once so the per-call path has
    no pad/convert traffic.
    """
    d_in, hidden = w1.shape
    action_dim = w3.shape[1]
    d_in_p = _round_up(d_in, _LANE)
    h_p = _round_up(hidden, _LANE)
    a_p = _round_up(action_dim, _LANE)
    f32 = jnp.float32
    return MLPParams(
        w1=_pad2(w1, d_in_p, h_p).astype(weight_dtype),
        b1=_pad2(b1.reshape(1, -1), 1, h_p).astype(f32),
        w2=_pad2(w2, h_p, h_p).astype(weight_dtype),
        b2=_pad2(b2.reshape(1, -1), 1, h_p).astype(f32),
        w3=_pad2(w3, h_p, a_p).astype(weight_dtype),
        b3=_pad2(b3.reshape(1, -1), 1, a_p).astype(f32),
        d_in=int(d_in), hidden=int(hidden), action_dim=int(action_dim),
    )


def _mlp_kernel(x_ref, w1_ref, b1_ref, w2_ref, b2_ref, w3_ref, b3_ref, o_ref):
    # x/weights arrive bf16 (full-rate MXU, half the DMA bytes); accumulate,
    # bias-add and ReLU in f32 on the VPU (v5e has no bf16 VALU).
    h1 = jnp.dot(x_ref[...], w1_ref[...], preferred_element_type=jnp.float32)
    h1 = jnp.maximum(h1 + b1_ref[...], 0.0)

    h2 = jnp.dot(h1.astype(jnp.bfloat16), w2_ref[...],
                 preferred_element_type=jnp.float32)
    h2 = jnp.maximum(h2 + b2_ref[...], 0.0)

    out = jnp.dot(h2.astype(jnp.bfloat16), w3_ref[...],
                  preferred_element_type=jnp.float32)
    o_ref[...] = (out + b3_ref[...]).astype(o_ref.dtype)


def _mlp_xla(x, p: MLPParams):
    """Plain-XLA path for tiny batches where launch/pad overhead dominates."""
    bf16 = jnp.bfloat16
    d_in_p = p.w1.shape[0]
    xb = jnp.pad(x, ((0, 0), (0, d_in_p - x.shape[1]))).astype(bf16)
    h1 = jnp.maximum(
        jnp.dot(xb, p.w1, preferred_element_type=jnp.float32) + p.b1, 0.0)
    h2 = jnp.maximum(
        jnp.dot(h1.astype(bf16), p.w2, preferred_element_type=jnp.float32)
        + p.b2, 0.0)
    q = jnp.dot(h2.astype(bf16), p.w3,
                preferred_element_type=jnp.float32) + p.b3
    return q[:, :p.action_dim]


def _mlp_pallas(x, p: MLPParams, *, block_m=512):
    """x: [B, d_in] -> q: [B, action_dim] f32, via one fused Pallas kernel."""
    B = x.shape[0]
    d_in_p, h_p = p.w1.shape
    a_p = p.w3.shape[1]

    tm = block_m if B >= block_m else _round_up(B, _SUBLANE_BF16)
    b_p = _round_up(B, tm)
    grid = (b_p // tm,)

    # x streamed in bf16; zero-pad batch to the tile and features to 128 lanes.
    xp = _pad2(x.astype(jnp.bfloat16), b_p, d_in_p)

    # VMEM budget: single-buffered resident params + double-buffered streamed
    # x/out tiles (bf16) + f32 intermediates; clamp to ~3/4 of physical VMEM
    # (~48 MiB on v7x, ~96 MiB on v5e/v6e).
    param_bytes = sum(_nbytes(t) for t in (p.w1, p.b1, p.w2, p.b2, p.w3, p.b3))
    tile_bytes = 2 * (tm * d_in_p + tm * a_p) * 2
    interm_bytes = 2 * tm * h_p * 4 + 2 * tm * h_p * 2
    vmem_est = param_bytes + tile_bytes + interm_bytes
    vmem_limit = int(min(max(2 * vmem_est, 16 << 20),
                         (_physical_vmem_bytes() * 3) // 4))

    flops = 2 * b_p * (d_in_p * h_p + h_p * h_p + h_p * a_p)
    bytes_accessed = _nbytes(xp) + param_bytes + b_p * a_p * 2

    def run(single_buffer_weights):
        if single_buffer_weights:
            def res(shape):
                # Constant index_map -> block never changes; one buffer only.
                return pl.BlockSpec(shape, lambda i: (0, 0),
                                    pipeline_mode=pl.Buffered(1))
        else:
            def res(shape):
                return pl.BlockSpec(shape, lambda i: (0, 0))

        return pl.pallas_call(
            _mlp_kernel,
            out_shape=jax.ShapeDtypeStruct((b_p, a_p), jnp.bfloat16),
            grid=grid,
            in_specs=[
                pl.BlockSpec((tm, d_in_p), lambda i: (i, 0)),   # x streams
                res((d_in_p, h_p)),                             # w1 resident
                res((1, h_p)),                                  # b1 resident
                res((h_p, h_p)),                                # w2 resident
                res((1, h_p)),                                  # b2 resident
                res((h_p, a_p)),                                # w3 resident
                res((1, a_p)),                                  # b3 resident
            ],
            out_specs=pl.BlockSpec((tm, a_p), lambda i: (i, 0)),
            compiler_params=pltpu.CompilerParams(
                dimension_semantics=("parallel",),
                vmem_limit_bytes=vmem_limit,
            ),
            cost_estimate=pl.CostEstimate(
                flops=flops, transcendentals=0, bytes_accessed=bytes_accessed),
        )(xp, p.w1, p.b1, p.w2, p.b2, p.w3, p.b3)

    try:
        out_p = run(single_buffer_weights=True)
    except Exception:
        # Fallback if this JAX build rejects pl.Buffered(1) on resident blocks.
        out_p = run(single_buffer_weights=False)

    # Slice off batch/lane padding (padded rows compute ReLU(bias) garbage that
    # is discarded here — do NOT reduce over batch inside the kernel).
    return out_p[:B, :p.action_dim].astype(jnp.float32)


def mlp_forward(x, params: MLPParams, *, block_m=512, min_pallas_batch=64):
    """x: [B, hist_len*state_shape] f32 -> q: [B, action_dim] f32."""
    if x.shape[0] < min_pallas_batch:
        # Tiny-batch short-circuit: a fused XLA dot beats kernel launch + pad.
        return _mlp_xla(x, params)
    return _mlp_pallas(x, params, block_m=block_m)


def init_params(key, d_in, hidden, d_out):
    """PyTorch-Linear-style init: U[-1/sqrt(fan_in), 1/sqrt(fan_in)]."""
    ks = jax.random.split(key, 6)

    def lin(kw, kb, fan_in, fan_out):
        bound = 1.0 / jnp.sqrt(jnp.float32(fan_in))
        w = jax.random.uniform(kw, (fan_in, fan_out), jnp.float32, -bound, bound)
        b = jax.random.uniform(kb, (1, fan_out), jnp.float32, -bound, bound)
        return w, b

    w1, b1 = lin(ks[0], ks[1], d_in, hidden)
    w2, b2 = lin(ks[2], ks[3], hidden, hidden)
    w3, b3 = lin(ks[4], ks[5], hidden, d_out)
    return w1, b1, w2, b2, w3, b3


if __name__ == "__main__":
    # args-equivalent small config
    batch = 2
    hist_len = 4        # input_dims[0]
    state_shape = 16    # input_dims[1]
    hidden_dim = 32     # args.hidden_dim
    action_dim = 4      # args.action_dim
    d_in = hist_len * state_shape

    key = jax.random.PRNGKey(0)
    k_x, k_p, k_big = jax.random.split(key, 3)

    # state input [B, hist_len, state_shape] flattened to [B, hist_len*state_shape]
    x = jax.random.normal(k_x, (batch, hist_len, state_shape), jnp.float32)
    x_flat = x.reshape(batch, d_in)

    w1, b1, w2, b2, w3, b3 = init_params(k_p, d_in, hidden_dim, action_dim)
    params = prepare_params(w1, b1, w2, b2, w3, b3)   # pad/cast once, at init

    # --- small-batch check: force the Pallas kernel path and compare against a
    # plain-JAX reference that mirrors the kernel numerics (bf16 matmul inputs,
    # f32 accumulation / bias / ReLU).
    q = mlp_forward(x_flat, params, min_pallas_batch=0)
    q = jax.block_until_ready(q)

    def bf16_round(a):
        return a.astype(jnp.bfloat16).astype(jnp.float32)

    def mm(a, w):
        return jnp.dot(bf16_round(a), bf16_round(w),
                       preferred_element_type=jnp.float32)

    h1 = jnp.maximum(mm(x_flat, w1) + b1, 0.0)
    h2 = jnp.maximum(mm(h1, w2) + b2, 0.0)
    q_ref = mm(h2, w3) + b3

    assert q.shape == (batch, action_dim)
    assert jnp.allclose(q, q_ref, atol=2e-2, rtol=2e-2), float(
        jnp.max(jnp.abs(q - q_ref)))

    # --- larger batch: exercises a multi-tile streamed grid (grid > 1) plus
    # batch padding; compare the Pallas path against the XLA fallback path.
    big_b = 1200
    xb = jax.random.normal(k_big, (big_b, d_in), jnp.float32)
    q_big = jax.block_until_ready(mlp_forward(xb, params, block_m=512))
    q_big_ref = _mlp_xla(xb, params)
    assert q_big.shape == (big_b, action_dim)
    assert jnp.allclose(q_big, q_big_ref, atol=2e-2, rtol=2e-2), float(
        jnp.max(jnp.abs(q_big - q_big_ref)))

    print("KERNEL_OK")
</pallas_src>

<mosaic_0001>
module attributes {stable_mosaic.version = 11 : i64} {
  func.func @_mlp_kernel(%arg0: i32, %arg1: memref<16x128xbf16, #tpu.memory_space<vmem>>, %arg2: memref<128x128xbf16, #tpu.memory_space<vmem>>, %arg3: memref<1x128xf32, #tpu.memory_space<vmem>>, %arg4: memref<128x128xbf16, #tpu.memory_space<vmem>>, %arg5: memref<1x128xf32, #tpu.memory_space<vmem>>, %arg6: memref<128x128xbf16, #tpu.memory_space<vmem>>, %arg7: memref<1x128xf32, #tpu.memory_space<vmem>>, %arg8: memref<16x128xbf16, #tpu.memory_space<vmem>>) attributes {dimension_semantics = [#tpu.dimension_semantics<parallel>], iteration_bounds = array<i64: 1>, scalar_prefetch = 0 : i64, scratch_operands = 0 : i64, tpu.core_type = #tpu.core_type<tc>, window_params = [{transform_indices = @transform_0, window_bounds = array<i64: 16, 128>}, {pipeline_mode = #tpu.pipeline_mode<synchronous>, transform_indices = @transform_1, window_bounds = array<i64: 128, 128>}, {pipeline_mode = #tpu.pipeline_mode<synchronous>, transform_indices = @transform_2, window_bounds = array<i64: 1, 128>}, {pipeline_mode = #tpu.pipeline_mode<synchronous>, transform_indices = @transform_3, window_bounds = array<i64: 128, 128>}, {pipeline_mode = #tpu.pipeline_mode<synchronous>, transform_indices = @transform_4, window_bounds = array<i64: 1, 128>}, {pipeline_mode = #tpu.pipeline_mode<synchronous>, transform_indices = @transform_5, window_bounds = array<i64: 128, 128>}, {pipeline_mode = #tpu.pipeline_mode<synchronous>, transform_indices = @transform_6, window_bounds = array<i64: 1, 128>}, {transform_indices = @transform_7, window_bounds = array<i64: 16, 128>}]} {
    %c0 = arith.constant 0 : index
    %c0_0 = arith.constant 0 : index
    %0 = vector.load %arg1[%c0, %c0_0] : memref<16x128xbf16, #tpu.memory_space<vmem>>, vector<16x128xbf16>
    %c0_1 = arith.constant 0 : index
    %c0_2 = arith.constant 0 : index
    %1 = vector.load %arg2[%c0_1, %c0_2] : memref<128x128xbf16, #tpu.memory_space<vmem>>, vector<128x128xbf16>
    %cst = arith.constant dense<0.000000e+00> : vector<16x128xf32>
    %2 = tpu.matmul %0, %1, %cst {dimension_numbers = #tpu.dot_dimension_numbers<[1], [0], [0], [1], [0, 0, 1, 1], [], []>} : vector<16x128xbf16>, vector<128x128xbf16>, vector<16x128xf32> -> vector<16x128xf32>
    %c0_3 = arith.constant 0 : index
    %c0_4 = arith.constant 0 : index
    %3 = vector.load %arg3[%c0_3, %c0_4] : memref<1x128xf32, #tpu.memory_space<vmem>>, vector<1x128xf32>
    %4 = vector.broadcast %3 : vector<1x128xf32> to vector<16x128xf32>
    %5 = arith.addf %2, %4 : vector<16x128xf32>
    %cst_5 = arith.constant 0.000000e+00 : f32
    %6 = vector.broadcast %cst_5 : f32 to vector<16x128xf32>
    %7 = arith.maximumf %5, %6 : vector<16x128xf32>
    %8 = arith.truncf %7 : vector<16x128xf32> to vector<16x128xbf16>
    %c0_6 = arith.constant 0 : index
    %c0_7 = arith.constant 0 : index
    %9 = vector.load %arg4[%c0_6, %c0_7] : memref<128x128xbf16, #tpu.memory_space<vmem>>, vector<128x128xbf16>
    %cst_8 = arith.constant dense<0.000000e+00> : vector<16x128xf32>
    %10 = tpu.matmul %8, %9, %cst_8 {dimension_numbers = #tpu.dot_dimension_numbers<[1], [0], [0], [1], [0, 0, 1, 1], [], []>} : vector<16x128xbf16>, vector<128x128xbf16>, vector<16x128xf32> -> vector<16x128xf32>
    %c0_9 = arith.constant 0 : index
    %c0_10 = arith.constant 0 : index
    %11 = vector.load %arg5[%c0_9, %c0_10] : memref<1x128xf32, #tpu.memory_space<vmem>>, vector<1x128xf32>
    %12 = vector.broadcast %11 : vector<1x128xf32> to vector<16x128xf32>
    %13 = arith.addf %10, %12 : vector<16x128xf32>
    %cst_11 = arith.constant 0.000000e+00 : f32
    %14 = vector.broadcast %cst_11 : f32 to vector<16x128xf32>
    %15 = arith.maximumf %13, %14 : vector<16x128xf32>
    %16 = arith.truncf %15 : vector<16x128xf32> to vector<16x128xbf16>
    %c0_12 = arith.constant 0 : index
    %c0_13 = arith.constant 0 : index
    %17 = vector.load %arg6[%c0_12, %c0_13] : memref<128x128xbf16, #tpu.memory_space<vmem>>, vector<128x128xbf16>
    %cst_14 = arith.constant dense<0.000000e+00> : vector<16x128xf32>
    %18 = tpu.matmul %16, %17, %cst_14 {dimension_numbers = #tpu.dot_dimension_numbers<[1], [0], [0], [1], [0, 0, 1, 1], [], []>} : vector<16x128xbf16>, vector<128x128xbf16>, vector<16x128xf32> -> vector<16x128xf32>
    %c0_15 = arith.constant 0 : index
    %c0_16 = arith.constant 0 : index
    %19 = vector.load %arg7[%c0_15, %c0_16] : memref<1x128xf32, #tpu.memory_space<vmem>>, vector<1x128xf32>
    %20 = vector.broadcast %19 : vector<1x128xf32> to vector<16x128xf32>
    %21 = arith.addf %18, %20 : vector<16x128xf32>
    %22 = arith.truncf %21 : vector<16x128xf32> to vector<16x128xbf16>
    %c0_17 = arith.constant 0 : index
    %c0_18 = arith.constant 0 : index
    %23 = vector.load %arg8[%c0_17, %c0_18] : memref<16x128xbf16, #tpu.memory_space<vmem>>, vector<16x128xbf16>
    tpu.vector_store %arg8[%c0_17, %c0_18], %22 {strides = array<i32>} : memref<16x128xbf16, #tpu.memory_space<vmem>>, vector<16x128xbf16>,
    return
  }
  func.func @transform_0(%arg0: i32) -> (i32, i32) {
    %c0_i32 = arith.constant 0 : i32
    %c0_i32_0 = arith.constant 0 : i32
    return %arg0, %c0_i32 : i32, i32
  }
  func.func @transform_1(%arg0: i32) -> (i32, i32) {
    %c0_i32 = arith.constant 0 : i32
    %c0_i32_0 = arith.constant 0 : i32
    %c0_i32_1 = arith.constant 0 : i32
    return %c0_i32, %c0_i32_0 : i32, i32
  }
  func.func @transform_2(%arg0: i32) -> (i32, i32) {
    %c0_i32 = arith.constant 0 : i32
    %c0_i32_0 = arith.constant 0 : i32
    %c0_i32_1 = arith.constant 0 : i32
    return %c0_i32, %c0_i32_0 : i32, i32
  }
  func.func @transform_3(%arg0: i32) -> (i32, i32) {
    %c0_i32 = arith.constant 0 : i32
    %c0_i32_0 = arith.constant 0 : i32
    %c0_i32_1 = arith.constant 0 : i32
    return %c0_i32, %c0_i32_0 : i32, i32
  }
  func.func @transform_4(%arg0: i32) -> (i32, i32) {
    %c0_i32 = arith.constant 0 : i32
    %c0_i32_0 = arith.constant 0 : i32
    %c0_i32_1 = arith.constant 0 : i32
    return %c0_i32, %c0_i32_0 : i32, i32
  }
  func.func @transform_5(%arg0: i32) -> (i32, i32) {
    %c0_i32 = arith.constant 0 : i32
    %c0_i32_0 = arith.constant 0 : i32
    %c0_i32_1 = arith.constant 0 : i32
    return %c0_i32, %c0_i32_0 : i32, i32
  }
  func.func @transform_6(%arg0: i32) -> (i32, i32) {
    %c0_i32 = arith.constant 0 : i32
    %c0_i32_0 = arith.constant 0 : i32
    %c0_i32_1 = arith.constant 0 : i32
    return %c0_i32, %c0_i32_0 : i32, i32
  }
  func.func @transform_7(%arg0: i32) -> (i32, i32) {
    %c0_i32 = arith.constant 0 : i32
    %c0_i32_0 = arith.constant 0 : i32
    return %arg0, %c0_i32 : i32, i32
  }
}

module attributes {stable_mosaic.version = 11 : i64} {
  func.func @_mlp_kernel(%arg0: i32, %arg1: memref<16x128xbf16, #tpu.memory_space<vmem>>, %arg2: memref<128x128xbf16, #tpu.memory_space<vmem>>, %arg3: memref<1x128xf32, #tpu.memory_space<vmem>>, %arg4: memref<128x128xbf16, #tpu.memory_space<vmem>>, %arg5: memref<1x128xf32, #tpu.memory_space<vmem>>, %arg6: memref<128x128xbf16, #tpu.memory_space<vmem>>, %arg7: memref<1x128xf32, #tpu.memory_space<vmem>>, %arg8: memref<16x128xbf16, #tpu.memory_space<vmem>>) attributes {dimension_semantics = [#tpu.dimension_semantics<parallel>], iteration_bounds = array<i64: 1>, scalar_prefetch = 0 : i64, scratch_operands = 0 : i64, tpu.core_type = #tpu.core_type<tc>, window_params = [{transform_indices = @transform_0, window_bounds = array<i64: 16, 128>}, {pipeline_mode = #tpu.pipeline_mode<synchronous>, transform_indices = @transform_1, window_bounds = array<i64: 128, 128>}, {pipeline_mode = #tpu.pipeline_mode<synchronous>, transform_indices = @transform_2, window_bounds = array<i64: 1, 128>}, {pipeline_mode = #tpu.pipeline_mode<synchronous>, transform_indices = @transform_3, window_bounds = array<i64: 128, 128>}, {pipeline_mode = #tpu.pipeline_mode<synchronous>, transform_indices = @transform_4, window_bounds = array<i64: 1, 128>}, {pipeline_mode = #tpu.pipeline_mode<synchronous>, transform_indices = @transform_5, window_bounds = array<i64: 128, 128>}, {pipeline_mode = #tpu.pipeline_mode<synchronous>, transform_indices = @transform_6, window_bounds = array<i64: 1, 128>}, {transform_indices = @transform_7, window_bounds = array<i64: 16, 128>}]} {
    %c0 = arith.constant 0 : index
    %c0_0 = arith.constant 0 : index
    %0 = vector.load %arg1[%c0, %c0_0] : memref<16x128xbf16, #tpu.memory_space<vmem>>, vector<16x128xbf16>
    %c0_1 = arith.constant 0 : index
    %c0_2 = arith.constant 0 : index
    %1 = vector.load %arg2[%c0_1, %c0_2] : memref<128x128xbf16, #tpu.memory_space<vmem>>, vector<128x128xbf16>
    %cst = arith.constant dense<0.000000e+00> : vector<16x128xf32>
    %2 = tpu.matmul %0, %1, %cst {dimension_numbers = #tpu.dot_dimension_numbers<[1], [0], [0], [1], [0, 0, 1, 1], [], []>} : vector<16x128xbf16>, vector<128x128xbf16>, vector<16x128xf32> -> vector<16x128xf32>
    %c0_3 = arith.constant 0 : index
    %c0_4 = arith.constant 0 : index
    %3 = vector.load %arg3[%c0_3, %c0_4] : memref<1x128xf32, #tpu.memory_space<vmem>>, vector<1x128xf32>
    %4 = vector.broadcast %3 : vector<1x128xf32> to vector<16x128xf32>
    %5 = arith.addf %2, %4 : vector<16x128xf32>
    %cst_5 = arith.constant 0.000000e+00 : f32
    %6 = vector.broadcast %cst_5 : f32 to vector<16x128xf32>
    %7 = arith.maximumf %5, %6 : vector<16x128xf32>
    %8 = arith.truncf %7 : vector<16x128xf32> to vector<16x128xbf16>
    %c0_6 = arith.constant 0 : index
    %c0_7 = arith.constant 0 : index
    %9 = vector.load %arg4[%c0_6, %c0_7] : memref<128x128xbf16, #tpu.memory_space<vmem>>, vector<128x128xbf16>
    %cst_8 = arith.constant dense<0.000000e+00> : vector<16x128xf32>
    %10 = tpu.matmul %8, %9, %cst_8 {dimension_numbers = #tpu.dot_dimension_numbers<[1], [0], [0], [1], [0, 0, 1, 1], [], []>} : vector<16x128xbf16>, vector<128x128xbf16>, vector<16x128xf32> -> vector<16x128xf32>
    %c0_9 = arith.constant 0 : index
    %c0_10 = arith.constant 0 : index
    %11 = vector.load %arg5[%c0_9, %c0_10] : memref<1x128xf32, #tpu.memory_space<vmem>>, vector<1x128xf32>
    %12 = vector.broadcast %11 : vector<1x128xf32> to vector<16x128xf32>
    %13 = arith.addf %10, %12 : vector<16x128xf32>
    %cst_11 = arith.constant 0.000000e+00 : f32
    %14 = vector.broadcast %cst_11 : f32 to vector<16x128xf32>
    %15 = arith.maximumf %13, %14 : vector<16x128xf32>
    %16 = arith.truncf %15 : vector<16x128xf32> to vector<16x128xbf16>
    %c0_12 = arith.constant 0 : index
    %c0_13 = arith.constant 0 : index
    %17 = vector.load %arg6[%c0_12, %c0_13] : memref<128x128xbf16, #tpu.memory_space<vmem>>, vector<128x128xbf16>
    %cst_14 = arith.constant dense<0.000000e+00> : vector<16x128xf32>
    %18 = tpu.matmul %16, %17, %cst_14 {dimension_numbers = #tpu.dot_dimension_numbers<[1], [0], [0], [1], [0, 0, 1, 1], [], []>} : vector<16x128xbf16>, vector<128x128xbf16>, vector<16x128xf32> -> vector<16x128xf32>
    %c0_15 = arith.constant 0 : index
    %c0_16 = arith.constant 0 : index
    %19 = vector.load %arg7[%c0_15, %c0_16] : memref<1x128xf32, #tpu.memory_space<vmem>>, vector<1x128xf32>
    %20 = vector.broadcast %19 : vector<1x128xf32> to vector<16x128xf32>
    %21 = arith.addf %18, %20 : vector<16x128xf32>
    %22 = arith.truncf %21 : vector<16x128xf32> to vector<16x128xbf16>
    %c0_17 = arith.constant 0 : index
    %c0_18 = arith.constant 0 : index
    %23 = vector.load %arg8[%c0_17, %c0_18] : memref<16x128xbf16, #tpu.memory_space<vmem>>, vector<16x128xbf16>
    tpu.vector_store %arg8[%c0_17, %c0_18], %22 {strides = array<i32>} : memref<16x128xbf16, #tpu.memory_space<vmem>>, vector<16x128xbf16>,
    return
  }
  func.func @transform_0(%arg0: i32) -> (i32, i32) {
    %c0_i32 = arith.constant 0 : i32
    %c0_i32_0 = arith.constant 0 : i32
    return %arg0, %c0_i32 : i32, i32
  }
  func.func @transform_1(%arg0: i32) -> (i32, i32) {
    %c0_i32 = arith.constant 0 : i32
    %c0_i32_0 = arith.constant 0 : i32
    %c0_i32_1 = arith.constant 0 : i32
    return %c0_i32, %c0_i32_0 : i32, i32
  }
  func.func @transform_2(%arg0: i32) -> (i32, i32) {
    %c0_i32 = arith.constant 0 : i32
    %c0_i32_0 = arith.constant 0 : i32
    %c0_i32_1 = arith.constant 0 : i32
    return %c0_i32, %c0_i32_0 : i32, i32
  }
  func.func @transform_3(%arg0: i32) -> (i32, i32) {
    %c0_i32 = arith.constant 0 : i32
    %c0_i32_0 = arith.constant 0 : i32
    %c0_i32_1 = arith.constant 0 : i32
    return %c0_i32, %c0_i32_0 : i32, i32
  }
  func.func @transform_4(%arg0: i32) -> (i32, i32) {
    %c0_i32 = arith.constant 0 : i32
    %c0_i32_0 = arith.constant 0 : i32
    %c0_i32_1 = arith.constant 0 : i32
    return %c0_i32, %c0_i32_0 : i32, i32
  }
  func.func @transform_5(%arg0: i32) -> (i32, i32) {
    %c0_i32 = arith.constant 0 : i32
    %c0_i32_0 = arith.constant 0 : i32
    %c0_i32_1 = arith.constant 0 : i32
    return %c0_i32, %c0_i32_0 : i32, i32
  }
  func.func @transform_6(%arg0: i32) -> (i32, i32) {
    %c0_i32 = arith.constant 0 : i32
    %c0_i32_0 = arith.constant 0 : i32
    %c0_i32_1 = arith.constant 0 : i32
    return %c0_i32, %c0_i32_0 : i32, i32
  }
  func.func @transform_7(%arg0: i32) -> (i32, i32) {
    %c0_i32 = arith.constant 0 : i32
    %c0_i32_0 = arith.constant 0 : i32
    return %arg0, %c0_i32 : i32, i32
  }
}

</mosaic_0001>

<bundles_post_ra>
// kernel: tpu_custom_call.1
= control target key start
LH: loop header
LB: loop body
LE: loop exit
PB: predicated region body
PF: predicated region fallthrough
CT: control target
= control target key end

     0   :  { %12 = vsyncpa [#allocation3], 0  ;;  %s729_s0 = inlined_call_operand.hbm [shape: bf16[16,128], index: 0, kind: input, shape index: {}]   ;;  %s730_s1 = inlined_call_operand.hbm [shape: bf16[128,128], index: 1, kind: input, shape index: {}]   ;;  %s731_s2 = inlined_call_operand.vmem [shape: f32[1,128], index: 2, kind: input, shape index: {}]   ;;  %s732_s3 = inlined_call_operand.hbm [shape: bf16[128,128], index: 3, kind: input, shape index: {}]   ;;  %s733_s4 = inlined_call_operand.vmem [shape: f32[1,128], index: 4, kind: input, shape index: {}]   ;;  %s734_s5 = inlined_call_operand.hbm [shape: bf16[128,128], index: 5, kind: input, shape index: {}]   ;;  %s735_s6 = inlined_call_operand.vmem [shape: f32[1,128], index: 6, kind: input, shape index: {}]   ;;  %s736_s7 = inlined_call_operand.hbm [shape: bf16[16,128], index: 7, kind: output, shape index: {}]  }
   0x1   :  { %13 = vsyncpa [#allocation6], 0 }
   0x2   :  { %14 = vsyncpa [#allocation9], 0 }
   0x3   :  { %15 = vsyncpa [#allocation4], 0  ;;  %s33_s26 = sshll.u32 %s730_s1, 4  ;;  %s643_s27 = smov [#allocation5]   ;;  %s34_s26 = int_to_ptr.hbm [resolvable:$true] %s33_s26 }
   0x4   :  { %s35_s28 = sshll.u32 %s643_s27, 4  ;;  %s20_s8 = sshll.u32 %s729_s0, 4  ;;  %s36_s28 = int_to_ptr.vmem [resolvable:$true] %s35_s28  ;;  %s21_s8 = int_to_ptr.hbm [resolvable:$true] %s20_s8 }
   0x5   :  { %s644_s9 = smov 64   ;;  %s645_s10 = smov 4  }
   0x6   :  { %41 = dma.hbm_to_vmem [thread:$0]  %s34_s26, 1024, %s36_s28, [#allocation6], %s644_s9, %s644_s9, %s645_s10  }
   0x7   :  { %s646_s11 = smov [#allocation2]   ;;  %s48_s1 = sshll.u32 %s732_s3, 4  ;;  %s49_s1 = int_to_ptr.hbm [resolvable:$true] %s48_s1 }
   0x8   :  { %s22_s12 = sshll.u32 %s646_s11, 4  ;;  %s63_s16 = sshll.u32 %s734_s5, 4  ;;  %s23_s12 = int_to_ptr.vmem [resolvable:$true] %s22_s12  ;;  %s64_s16 = int_to_ptr.hbm [resolvable:$true] %s63_s16 }
   0x9   :  { %28 = dma.hbm_to_vmem [thread:$0]  %s21_s8, 128, %s23_s12, [#allocation3], %s644_s9, %s644_s9, %s645_s10  }
   0xa   :  { %s647_s17 = smov [#allocation7]   ;;  %s648_s19 = smov [#allocation8]  }
   0xb   :  { %s50_s18 = sshll.u32 %s647_s17, 4  ;;  %s65_s3 = sshll.u32 %s648_s19, 4  ;;  %s51_s18 = int_to_ptr.vmem [resolvable:$true] %s50_s18  ;;  %s66_s3 = int_to_ptr.vmem [resolvable:$true] %s65_s3 }
   0xc   :  { %56 = dma.hbm_to_vmem [thread:$0]  %s49_s1, 1024, %s51_s18, [#allocation6], %s644_s9, %s644_s9, %s645_s10  }
   0xd   :  { %71 = dma.hbm_to_vmem [thread:$0]  %s64_s16, 1024, %s66_s3, [#allocation9], %s644_s9, %s644_s9, %s645_s10  }
   0xe   :  { %635 = dma.done.wait [#allocation3], 128  }
   0xf   :  { %636 = vsyncadd [#allocation3], 4294967168 }
  0x10   :  { %637 = dma.done.wait [#allocation6], 2048  }
  0x11   :  { %638 = vsyncadd [#allocation6], 4294965248 }
  0x12   :  { %639 = dma.done.wait [#allocation9], 1024  }
  0x13   :  { %640 = vsyncadd [#allocation9], 4294966272  ;;  %v483_v0 = vld [vmem:[#allocation5 + $0x38] sm:$0xff]  ;;  %v482_v1 = vld [vmem:[#allocation5 + $0x30] sm:$0xff]  ;;  %s649_s24 = smov [#allocation10]   ;;  %s360_s28 = sshll.u32 %s736_s7, 4  ;;  %s361_s28 = int_to_ptr.hbm [resolvable:$true] %s360_s28 }
  0x14   :  { %166 = vmatpush.bf16.msra.mxu0 %v483_v0  ;;  %v491_v2 = vld [vmem:[#allocation7 + $0x38] sm:$0xff]  ;;  %v490_v3 = vld [vmem:[#allocation7 + $0x30] sm:$0xff]  ;;  %v481_v4 = vld [vmem:[#allocation5 + $0x28] sm:$0xff]  ;;  %s358_s25 = sshll.u32 %s649_s24, 4  ;;  %s359_s25 = int_to_ptr.vmem [resolvable:$true] %s358_s25 }
  0x15   :  { %251 = vmatpush.bf16.msra.mxu1 %v491_v2  ;;  %v489_v5 = vld [vmem:[#allocation7 + $0x28] sm:$0xff]  ;;  %v480_v6 = vld [vmem:[#allocation5 + $0x20] sm:$0xff]  ;;  %v479_v8 = vld [vmem:[#allocation5 + $0x18] sm:$0xff] }
  0x16   :  { %v488_v7 = vld [vmem:[#allocation7 + $0x20] sm:$0xff]  ;;  %v478_v9 = vld [vmem:[#allocation5 + $0x10] sm:$0xff]  ;;  %v477_v10 = vld [vmem:[#allocation5 + $0x8] sm:$0xff] }
  0x17   :  { %v476_v11 = vld [vmem:[#allocation5] sm:$0xff]  ;;  %v475_v12 = vld [vmem:[#allocation2] sm:$0xff]  ;;  %v486_v14 = vld [vmem:[#allocation7 + $0x10] sm:$0xff] }
  0x18   :  { %167 = vmatpush.bf16.msra.mxu0 %v482_v1  ;;  %v487_v13 = vld [vmem:[#allocation7 + $0x18] sm:$0xff]  ;;  %v485_v15 = vld [vmem:[#allocation7 + $0x8] sm:$0xff]  ;;  %v484_v16 = vld [vmem:[#allocation7] sm:$0xff] }
  0x19   :  { %252 = vmatpush.bf16.msra.mxu1 %v490_v3  ;;  %v499_v17 = vld [vmem:[#allocation8 + $0x38] sm:$0xff]  ;;  %v498_v18 = vld [vmem:[#allocation8 + $0x30] sm:$0xff]  ;;  %v497_v19 = vld [vmem:[#allocation8 + $0x28] sm:$0xff] }
  0x1a   :  { %336 = vmatpush.bf16.msra.mxu2 %v499_v17  ;;  %v496_v20 = vld [vmem:[#allocation8 + $0x20] sm:$0xff]  ;;  %v512_v22 = vld [vmem:[%s731_s2] ss:$0 sm:$0xff]  ;;  %v494_v30 = vld [vmem:[#allocation8 + $0x10] sm:$0xff] }
  0x1b   :  { %v495_v29 = vld [vmem:[#allocation8 + $0x18] sm:$0xff]  ;;  %v493_v31 = vld [vmem:[#allocation8 + $0x8] sm:$0xff]  ;;  %v492_v32 = vld [vmem:[#allocation8] sm:$0xff] }
  0x1c   :  { %168 = vmatpush.bf16.msra.mxu0 %v481_v4  ;;  %v513_v34 = vld [vmem:[%s733_s4] ss:$0 sm:$0xff] }
  0x1d   :  { %253 = vmatpush.bf16.msra.mxu1 %v489_v5  ;;  %v514_v42 = vld [vmem:[%s735_s6] ss:$0 sm:$0xff] }
  0x1e   :  { %337 = vmatpush.bf16.msra.mxu2 %v498_v18 }
  0x20   :  { %169 = vmatpush.bf16.msra.mxu0 %v480_v6 }
  0x21   :  { %254 = vmatpush.bf16.msra.mxu1 %v488_v7 }
  0x22   :  { %338 = vmatpush.bf16.msra.mxu2 %v497_v19 }
  0x24   :  { %170 = vmatpush.bf16.msra.mxu0 %v479_v8 }
  0x25   :  { %255 = vmatpush.bf16.msra.mxu1 %v487_v13 }
  0x26   :  { %339 = vmatpush.bf16.msra.mxu2 %v496_v20 }
  0x28   :  { %171 = vmatpush.bf16.msra.mxu0 %v478_v9 }
  0x29   :  { %256 = vmatpush.bf16.msra.mxu1 %v486_v14 }
  0x2a   :  { %340 = vmatpush.bf16.msra.mxu2 %v495_v29 }
  0x2c   :  { %172 = vmatpush.bf16.msra.mxu0 %v477_v10 }
  0x2d   :  { %257 = vmatpush.bf16.msra.mxu1 %v485_v15 }
  0x2e   :  { %341 = vmatpush.bf16.msra.mxu2 %v494_v30 }
  0x30   :  { %173 = vmatpush.bf16.msra.mxu0 %v476_v11 }
  0x31   :  { %258 = vmatpush.bf16.msra.mxu1 %v484_v16 }
  0x32   :  { %342 = vmatpush.bf16.msra.mxu2 %v493_v31 }
  0x33   :  { %174 = vmatmul.bf16.vlgmr.msra.gmra.mxu0 %v475_v12 }
  0x36   :  { %343 = vmatpush.bf16.msra.mxu2 %v492_v32 }
  0xb0   :  { %v175_v21 = vpop.f32.mrf.mxu0 }
  0xb1   :  { %v176_v23 = vadd.f32 %v512_v22, %v175_v21 }
  0xb3   :  { %v180_v26 = vmax.f32 %v176_v23, 0.0 }
  0xb8   :  { %v177_v24 = vpop.f32.mrf.mxu0 }
  0xb9   :  { %v178_v25 = vadd.f32 %v512_v22, %v177_v24 }
  0xbb   :  { %v181_v27 = vmax.f32 %v178_v25, 0.0 }
  0xbd   :  { %v182_v28 = vpack.c.bf16 %v181_v27, %v180_v26 }
  0xbf   :  { %259 = vmatmul.bf16.vlgmr.msra.gmra.mxu1 %v182_v28 }
 0x13c   :  { %v260_v33 = vpop.f32.mrf.mxu1 }
 0x13d   :  { %v261_v35 = vadd.f32 %v513_v34, %v260_v33 }
 0x13f   :  { %v265_v38 = vmax.f32 %v261_v35, 0.0 }
 0x144   :  { %v262_v36 = vpop.f32.mrf.mxu1 }
 0x145   :  { %v263_v37 = vadd.f32 %v513_v34, %v262_v36 }
 0x147   :  { %v266_v39 = vmax.f32 %v263_v37, 0.0 }
 0x149   :  { %v267_v40 = vpack.c.bf16 %v266_v39, %v265_v38 }
 0x14b   :  { %344 = vmatmul.bf16.vlgmr.msra.gmra.mxu2 %v267_v40 }
 0x1ce   :  { %v345_v41 = vpop.f32.mrf.mxu2 }
 0x1cf   :  { %v346_v44 = vadd.f32 %v514_v42, %v345_v41 }
 0x1d6   :  { %v347_v43 = vpop.f32.mrf.mxu2 }
 0x1d7   :  { %v348_v45 = vadd.f32 %v514_v42, %v347_v43 }
 0x1d9   :  { %v503_v46 = vpack.c.bf16 %v348_v45, %v346_v44 }
 0x1db   :  { %504 = vst [vmem:[#allocation10] sm:$0xff] %v503_v46  }
 0x1dc   :  { %366 = dma.vmem_to_hbm [thread:$0]  %s359_s25, 128, %s361_s28, [#allocation4], %s644_s9, %s644_s9, %s645_s10  }
 0x1dd   :  { %641 = dma.done.wait [#allocation4], 128  }
 0x1de   :  { %642 = vsyncadd [#allocation4], 4294967168 }
 0x1df   :  { %371 = vsyncpa [#allocation3], 1 }
 0x1e0   :  { %372 = vsyncpa [#allocation6], 1 }
 0x1e1   :  { %373 = vsyncpa [#allocation9], 1 }
 0x1e2   :  { %374 = vsyncpa [#allocation4], 1 }

// kernel: tpu_custom_call.1
= control target key start
LH: loop header
LB: loop body
LE: loop exit
PB: predicated region body
PF: predicated region fallthrough
CT: control target
= control target key end

     0   :  { %12 = vsyncpa [#allocation3], 0  ;;  %s729_s0 = inlined_call_operand.hbm [shape: bf16[16,128], index: 0, kind: input, shape index: {}]   ;;  %s730_s1 = inlined_call_operand.hbm [shape: bf16[128,128], index: 1, kind: input, shape index: {}]   ;;  %s731_s2 = inlined_call_operand.vmem [shape: f32[1,128], index: 2, kind: input, shape index: {}]   ;;  %s732_s3 = inlined_call_operand.hbm [shape: bf16[128,128], index: 3, kind: input, shape index: {}]   ;;  %s733_s4 = inlined_call_operand.vmem [shape: f32[1,128], index: 4, kind: input, shape index: {}]   ;;  %s734_s5 = inlined_call_operand.hbm [shape: bf16[128,128], index: 5, kind: input, shape index: {}]   ;;  %s735_s6 = inlined_call_operand.vmem [shape: f32[1,128], index: 6, kind: input, shape index: {}]   ;;  %s736_s7 = inlined_call_operand.hbm [shape: bf16[16,128], index: 7, kind: output, shape index: {}]  }
   0x1   :  { %13 = vsyncpa [#allocation6], 0 }
   0x2   :  { %14 = vsyncpa [#allocation9], 0 }
   0x3   :  { %15 = vsyncpa [#allocation4], 0  ;;  %s33_s26 = sshll.u32 %s730_s1, 4  ;;  %s643_s27 = smov [#allocation5]   ;;  %s34_s26 = int_to_ptr.hbm [resolvable:$true] %s33_s26 }
   0x4   :  { %s35_s28 = sshll.u32 %s643_s27, 4  ;;  %s20_s8 = sshll.u32 %s729_s0, 4  ;;  %s36_s28 = int_to_ptr.vmem [resolvable:$true] %s35_s28  ;;  %s21_s8 = int_to_ptr.hbm [resolvable:$true] %s20_s8 }
   0x5   :  { %s644_s9 = smov 64   ;;  %s645_s10 = smov 4  }
   0x6   :  { %41 = dma.hbm_to_vmem [thread:$0]  %s34_s26, 1024, %s36_s28, [#allocation6], %s644_s9, %s644_s9, %s645_s10  }
   0x7   :  { %s646_s11 = smov [#allocation2]   ;;  %s48_s1 = sshll.u32 %s732_s3, 4  ;;  %s49_s1 = int_to_ptr.hbm [resolvable:$true] %s48_s1 }
   0x8   :  { %s22_s12 = sshll.u32 %s646_s11, 4  ;;  %s63_s16 = sshll.u32 %s734_s5, 4  ;;  %s23_s12 = int_to_ptr.vmem [resolvable:$true] %s22_s12  ;;  %s64_s16 = int_to_ptr.hbm [resolvable:$true] %s63_s16 }
   0x9   :  { %28 = dma.hbm_to_vmem [thread:$0]  %s21_s8, 128, %s23_s12, [#allocation3], %s644_s9, %s644_s9, %s645_s10  }
   0xa   :  { %s647_s17 = smov [#allocation7]   ;;  %s648_s19 = smov [#allocation8]  }
   0xb   :  { %s50_s18 = sshll.u32 %s647_s17, 4  ;;  %s65_s3 = sshll.u32 %s648_s19, 4  ;;  %s51_s18 = int_to_ptr.vmem [resolvable:$true] %s50_s18  ;;  %s66_s3 = int_to_ptr.vmem [resolvable:$true] %s65_s3 }
   0xc   :  { %56 = dma.hbm_to_vmem [thread:$0]  %s49_s1, 1024, %s51_s18, [#allocation6], %s644_s9, %s644_s9, %s645_s10  }
   0xd   :  { %71 = dma.hbm_to_vmem [thread:$0]  %s64_s16, 1024, %s66_s3, [#allocation9], %s644_s9, %s644_s9, %s645_s10  }
   0xe   :  { %635 = dma.done.wait [#allocation3], 128  }
   0xf   :  { %636 = vsyncadd [#allocation3], 4294967168 }
  0x10   :  { %637 = dma.done.wait [#allocation6], 2048  }
  0x11   :  { %638 = vsyncadd [#allocation6], 4294965248 }
  0x12   :  { %639 = dma.done.wait [#allocation9], 1024  }
  0x13   :  { %640 = vsyncadd [#allocation9], 4294966272  ;;  %v483_v0 = vld [vmem:[#allocation5 + $0x38] sm:$0xff]  ;;  %v482_v1 = vld [vmem:[#allocation5 + $0x30] sm:$0xff]  ;;  %s649_s24 = smov [#allocation10]   ;;  %s360_s28 = sshll.u32 %s736_s7, 4  ;;  %s361_s28 = int_to_ptr.hbm [resolvable:$true] %s360_s28 }
  0x14   :  { %166 = vmatpush.bf16.msra.mxu0 %v483_v0  ;;  %v491_v2 = vld [vmem:[#allocation7 + $0x38] sm:$0xff]  ;;  %v490_v3 = vld [vmem:[#allocation7 + $0x30] sm:$0xff]  ;;  %v481_v4 = vld [vmem:[#allocation5 + $0x28] sm:$0xff]  ;;  %s358_s25 = sshll.u32 %s649_s24, 4  ;;  %s359_s25 = int_to_ptr.vmem [resolvable:$true] %s358_s25 }
  0x15   :  { %251 = vmatpush.bf16.msra.mxu1 %v491_v2  ;;  %v489_v5 = vld [vmem:[#allocation7 + $0x28] sm:$0xff]  ;;  %v480_v6 = vld [vmem:[#allocation5 + $0x20] sm:$0xff]  ;;  %v479_v8 = vld [vmem:[#allocation5 + $0x18] sm:$0xff] }
  0x16   :  { %v488_v7 = vld [vmem:[#allocation7 + $0x20] sm:$0xff]  ;;  %v478_v9 = vld [vmem:[#allocation5 + $0x10] sm:$0xff]  ;;  %v477_v10 = vld [vmem:[#allocation5 + $0x8] sm:$0xff] }
  0x17   :  { %v476_v11 = vld [vmem:[#allocation5] sm:$0xff]  ;;  %v475_v12 = vld [vmem:[#allocation2] sm:$0xff]  ;;  %v486_v14 = vld [vmem:[#allocation7 + $0x10] sm:$0xff] }
  0x18   :  { %167 = vmatpush.bf16.msra.mxu0 %v482_v1  ;;  %v487_v13 = vld [vmem:[#allocation7 + $0x18] sm:$0xff]  ;;  %v485_v15 = vld [vmem:[#allocation7 + $0x8] sm:$0xff]  ;;  %v484_v16 = vld [vmem:[#allocation7] sm:$0xff] }
  0x19   :  { %252 = vmatpush.bf16.msra.mxu1 %v490_v3  ;;  %v499_v17 = vld [vmem:[#allocation8 + $0x38] sm:$0xff]  ;;  %v498_v18 = vld [vmem:[#allocation8 + $0x30] sm:$0xff]  ;;  %v497_v19 = vld [vmem:[#allocation8 + $0x28] sm:$0xff] }
  0x1a   :  { %336 = vmatpush.bf16.msra.mxu2 %v499_v17  ;;  %v496_v20 = vld [vmem:[#allocation8 + $0x20] sm:$0xff]  ;;  %v512_v22 = vld [vmem:[%s731_s2] ss:$0 sm:$0xff]  ;;  %v494_v30 = vld [vmem:[#allocation8 + $0x10] sm:$0xff] }
  0x1b   :  { %v495_v29 = vld [vmem:[#allocation8 + $0x18] sm:$0xff]  ;;  %v493_v31 = vld [vmem:[#allocation8 + $0x8] sm:$0xff]  ;;  %v492_v32 = vld [vmem:[#allocation8] sm:$0xff] }
  0x1c   :  { %168 = vmatpush.bf16.msra.mxu0 %v481_v4  ;;  %v513_v34 = vld [vmem:[%s733_s4] ss:$0 sm:$0xff] }
  0x1d   :  { %253 = vmatpush.bf16.msra.mxu1 %v489_v5  ;;  %v514_v42 = vld [vmem:[%s735_s6] ss:$0 sm:$0xff] }
  0x1e   :  { %337 = vmatpush.bf16.msra.mxu2 %v498_v18 }
  0x20   :  { %169 = vmatpush.bf16.msra.mxu0 %v480_v6 }
  0x21   :  { %254 = vmatpush.bf16.msra.mxu1 %v488_v7 }
  0x22   :  { %338 = vmatpush.bf16.msra.mxu2 %v497_v19 }
  0x24   :  { %170 = vmatpush.bf16.msra.mxu0 %v479_v8 }
  0x25   :  { %255 = vmatpush.bf16.msra.mxu1 %v487_v13 }
  0x26   :  { %339 = vmatpush.bf16.msra.mxu2 %v496_v20 }
  0x28   :  { %171 = vmatpush.bf16.msra.mxu0 %v478_v9 }
  0x29   :  { %256 = vmatpush.bf16.msra.mxu1 %v486_v14 }
  0x2a   :  { %340 = vmatpush.bf16.msra.mxu2 %v495_v29 }
  0x2c   :  { %172 = vmatpush.bf16.msra.mxu0 %v477_v10 }
  0x2d   :  { %257 = vmatpush.bf16.msra.mxu1 %v485_v15 }
  0x2e   :  { %341 = vmatpush.bf16.msra.mxu2 %v494_v30 }
  0x30   :  { %173 = vmatpush.bf16.msra.mxu0 %v476_v11 }
  0x31   :  { %258 = vmatpush.bf16.msra.mxu1 %v484_v16 }
  0x32   :  { %342 = vmatpush.bf16.msra.mxu2 %v493_v31 }
  0x33   :  { %174 = vmatmul.bf16.vlgmr.msra.gmra.mxu0 %v475_v12 }
  0x36   :  { %343 = vmatpush.bf16.msra.mxu2 %v492_v32 }
  0xb0   :  { %v175_v21 = vpop.f32.mrf.mxu0 }
  0xb1   :  { %v176_v23 = vadd.f32 %v512_v22, %v175_v21 }
  0xb3   :  { %v180_v26 = vmax.f32 %v176_v23, 0.0 }
  0xb8   :  { %v177_v24 = vpop.f32.mrf.mxu0 }
  0xb9   :  { %v178_v25 = vadd.f32 %v512_v22, %v177_v24 }
  0xbb   :  { %v181_v27 = vmax.f32 %v178_v25, 0.0 }
  0xbd   :  { %v182_v28 = vpack.c.bf16 %v181_v27, %v180_v26 }
  0xbf   :  { %259 = vmatmul.bf16.vlgmr.msra.gmra.mxu1 %v182_v28 }
 0x13c   :  { %v260_v33 = vpop.f32.mrf.mxu1 }
 0x13d   :  { %v261_v35 = vadd.f32 %v513_v34, %v260_v33 }
 0x13f   :  { %v265_v38 = vmax.f32 %v261_v35, 0.0 }
 0x144   :  { %v262_v36 = vpop.f32.mrf.mxu1 }
 0x145   :  { %v263_v37 = vadd.f32 %v513_v34, %v262_v36 }
 0x147   :  { %v266_v39 = vmax.f32 %v263_v37, 0.0 }
 0x149   :  { %v267_v40 = vpack.c.bf16 %v266_v39, %v265_v38 }
 0x14b   :  { %344 = vmatmul.bf16.vlgmr.msra.gmra.mxu2 %v267_v40 }
 0x1ce   :  { %v345_v41 = vpop.f32.mrf.mxu2 }
 0x1cf   :  { %v346_v44 = vadd.f32 %v514_v42, %v345_v41 }
 0x1d6   :  { %v347_v43 = vpop.f32.mrf.mxu2 }
 0x1d7   :  { %v348_v45 = vadd.f32 %v514_v42, %v347_v43 }
 0x1d9   :  { %v503_v46 = vpack.c.bf16 %v348_v45, %v346_v44 }
 0x1db   :  { %504 = vst [vmem:[#allocation10] sm:$0xff] %v503_v46  }
 0x1dc   :  { %366 = dma.vmem_to_hbm [thread:$0]  %s359_s25, 128, %s361_s28, [#allocation4], %s644_s9, %s644_s9, %s645_s10  }
 0x1dd   :  { %641 = dma.done.wait [#allocation4], 128  }
 0x1de   :  { %642 = vsyncadd [#allocation4], 4294967168 }
 0x1df   :  { %371 = vsyncpa [#allocation3], 1 }
 0x1e0   :  { %372 = vsyncpa [#allocation6], 1 }
 0x1e1   :  { %373 = vsyncpa [#allocation9], 1 }
 0x1e2   :  { %374 = vsyncpa [#allocation4], 1 }

</bundles_post_ra>
